<compile_context>
chip_gen: v7x
topology: tpu7x:2x2x1
jax: 0.10.0
libtpu: 0.0.40
codegen_flags: <defaults>
</compile_context>

<pallas_src>
import functools

import jax
import jax.numpy as jnp
from jax.experimental import pallas as pl
from jax.experimental.pallas import tpu as pltpu

HIDDEN1 = 128
HIDDEN2 = 64

# Batches at or below this size take the single-invocation (gridless) path.
_SMALL_BATCH_MAX = 512


def policy_kernel(x_ref, w1_ref, b1_ref, w2_ref, b2_ref,
                  wm_ref, bm_ref, ws_ref, bs_ref,
                  mean_ref, std_ref, *, fc1_on_mxu):
    """Fused MLP forward: fc1+ReLU -> fc2+ReLU -> (mean, std=exp(log_std)).

    Outputs are compact (tile, action_dims) blocks -- no lane padding, so the
    HBM writeback is exactly the useful bytes.
    """
    x = x_ref[...]

    if fc1_on_mxu:
        # Batch-tiled path: K=obs_dims matmul on the MXU (Mosaic pads the tiny
        # contraction internally); hides under the fc2/head MXU chain and
        # frees the VALU/XLU slots that saturate first in this kernel.
        h1 = jnp.dot(x, w1_ref[...],
                     preferred_element_type=jnp.float32) + b1_ref[...]
    else:
        # Small-batch / latency path: a K=3 MXU pass would be nearly all
        # padding for a handful of rows, so use unrolled VPU broadcast-FMAs.
        tb = x.shape[0]
        h1 = jnp.broadcast_to(b1_ref[...], (tb, w1_ref.shape[1]))
        for k in range(x.shape[1]):     # obs_dims is static -> unrolled
            h1 = h1 + x[:, k:k + 1] * w1_ref[k:k + 1, :]
    h1 = jnp.maximum(h1, 0.0)

    # fc2 + ReLU (MXU).
    h2 = jnp.dot(h1, w2_ref[...],
                 preferred_element_type=jnp.float32) + b2_ref[...]
    h2 = jnp.maximum(h2, 0.0)

    # Heads: compact (tile, action_dims) results written straight out.
    # exp() runs on the EUP and touches only the log_std head (no discarded
    # lanes, so no spurious inf values anywhere).
    mean_ref[...] = jnp.dot(h2, wm_ref[...],
                            preferred_element_type=jnp.float32) + bm_ref[...]
    std_ref[...] = jnp.exp(
        jnp.dot(h2, ws_ref[...], preferred_element_type=jnp.float32)
        + bs_ref[...])


def _round_up(n, m):
    return ((n + m - 1) // m) * m


def policy_network_forward(x, params, *, batch_tile=2048):
    """Policy_Network forward as a single Pallas kernel.

    Args:
      x: (batch, obs_dims) float32 observations.
      params: dict with w1,b1,w2,b2,wm,bm,ws,bs (weights stored as (in, out),
        biases as (1, out)).
    Returns:
      (mean, std): each (batch, action_dims) float32.
    """
    batch, obs_dims = x.shape
    action_dims = params["wm"].shape[1]
    weights = (params["w1"], params["b1"], params["w2"], params["b2"],
               params["wm"], params["bm"], params["ws"], params["bs"])

    if batch <= _SMALL_BATCH_MAX:
        # Latency path: everything fits in VMEM.  No grid -> no pipeline
        # prologue/epilogue, no per-step bookkeeping, no double buffering.
        kernel = functools.partial(policy_kernel, fc1_on_mxu=False)
        mean, std = pl.pallas_call(
            kernel,
            out_shape=(
                jax.ShapeDtypeStruct((batch, action_dims), jnp.float32),
                jax.ShapeDtypeStruct((batch, action_dims), jnp.float32)),
            in_specs=[pl.BlockSpec(memory_space=pltpu.MemorySpace.VMEM)
                      for _ in range(1 + len(weights))],
            out_specs=(pl.BlockSpec(memory_space=pltpu.MemorySpace.VMEM),
                       pl.BlockSpec(memory_space=pltpu.MemorySpace.VMEM)),
        )(x, *weights)
        return mean, std

    # Throughput (rollout) path: tile the batch dim.  Tile is large enough to
    # amortize per-step overhead (~0.35 us/step) but capped so the grid keeps
    # >= ~4 steps for v7x's two TensorCores; always a multiple of 8 sublanes.
    tile = min(batch_tile, _round_up(pl.cdiv(batch, 4), 128))
    padded = _round_up(batch, tile)
    if padded != batch:
        # Pad rather than fall back to a gridless whole-array slab (which
        # could exceed scoped/physical VMEM for very large batches).
        x = jnp.pad(x, ((0, padded - batch), (0, 0)))
    steps = padded // tile

    kernel = functools.partial(policy_kernel, fc1_on_mxu=True)
    row = lambda i: (i, 0)     # batch-tiled operands
    pin = lambda i: (0, 0)     # weights: same block every step -> VMEM-resident
    # TODO(synk): downstream Normal(mean, std) sampling / log-prob could be
    # fused into the kernel tail for RL rollouts (and on v5e the fc2/head
    # matmul inputs could be cast to bf16) to push further past this point.
    mean, std = pl.pallas_call(
        kernel,
        out_shape=(
            jax.ShapeDtypeStruct((padded, action_dims), jnp.float32),
            jax.ShapeDtypeStruct((padded, action_dims), jnp.float32)),
        grid=(steps,),
        in_specs=[
            pl.BlockSpec((tile, obs_dims), row),
            pl.BlockSpec(params["w1"].shape, pin),
            pl.BlockSpec(params["b1"].shape, pin),
            pl.BlockSpec(params["w2"].shape, pin),
            pl.BlockSpec(params["b2"].shape, pin),
            pl.BlockSpec(params["wm"].shape, pin),
            pl.BlockSpec(params["bm"].shape, pin),
            pl.BlockSpec(params["ws"].shape, pin),
            pl.BlockSpec(params["bs"].shape, pin),
        ],
        out_specs=(pl.BlockSpec((tile, action_dims), row),
                   pl.BlockSpec((tile, action_dims), row)),
        compiler_params=pltpu.CompilerParams(
            dimension_semantics=("parallel",)),
    )(x, *weights)

    if padded != batch:
        mean = mean[:batch]
        std = std[:batch]
    return mean, std


def init_params(key, obs_dims, action_dims):
    """Deterministic init mimicking nn.Linear's U(-1/sqrt(fan_in), 1/sqrt(fan_in))."""
    def linear(k, fan_in, fan_out):
        kw, kb = jax.random.split(k)
        bound = 1.0 / jnp.sqrt(float(fan_in))
        w = jax.random.uniform(kw, (fan_in, fan_out), jnp.float32, -bound, bound)
        b = jax.random.uniform(kb, (1, fan_out), jnp.float32, -bound, bound)
        return w, b

    k1, k2, k3, k4 = jax.random.split(key, 4)
    w1, b1 = linear(k1, obs_dims, HIDDEN1)
    w2, b2 = linear(k2, HIDDEN1, HIDDEN2)
    wm, bm = linear(k3, HIDDEN2, action_dims)
    ws, bs = linear(k4, HIDDEN2, action_dims)
    return dict(w1=w1, b1=b1, w2=w2, b2=b2, wm=wm, bm=bm, ws=ws, bs=bs)


if __name__ == "__main__":
    # Swing-up pendulum dims: obs = 3 (cos, sin, theta_dot), action = 1.
    obs_dims, action_dims = 3, 1

    key = jax.random.PRNGKey(0)
    kx1, kx2, kp = jax.random.split(key, 3)
    params = init_params(kp, obs_dims, action_dims)

    def ref(xv, p):
        h1 = jnp.maximum(xv @ p["w1"] + p["b1"], 0.0)
        h2 = jnp.maximum(h1 @ p["w2"] + p["b2"], 0.0)
        return h2 @ p["wm"] + p["bm"], jnp.exp(h2 @ p["ws"] + p["bs"])

    fwd = jax.jit(policy_network_forward)

    # 1) Small-batch (single-env inference) path: gridless, VPU fc1.
    x_small = jax.random.normal(kx1, (8, obs_dims), dtype=jnp.float32)
    mean_s, std_s = fwd(x_small, params)
    jax.block_until_ready((mean_s, std_s))

    # 2) Batch-tiled rollout path; batch deliberately NOT a multiple of the
    #    tile to exercise the pad-and-slice handling.
    x_big = jax.random.normal(kx2, (1000, obs_dims), dtype=jnp.float32)
    mean_b, std_b = fwd(x_big, params)
    jax.block_until_ready((mean_b, std_b))

    for m, s, xv in ((mean_s, std_s, x_small), (mean_b, std_b, x_big)):
        m_ref, s_ref = ref(xv, params)
        assert m.shape == (xv.shape[0], action_dims)
        assert s.shape == (xv.shape[0], action_dims)
        assert jnp.allclose(m, m_ref, atol=1e-4, rtol=1e-4)
        assert jnp.allclose(s, s_ref, atol=1e-4, rtol=1e-4)

    print("KERNEL_OK")
</pallas_src>

<mosaic_0001>
module attributes {stable_mosaic.version = 11 : i64} {
  func.func @policy_kernel(%arg0: memref<8x3xf32, #tpu.memory_space<vmem>>, %arg1: memref<3x128xf32, #tpu.memory_space<vmem>>, %arg2: memref<1x128xf32, #tpu.memory_space<vmem>>, %arg3: memref<128x64xf32, #tpu.memory_space<vmem>>, %arg4: memref<1x64xf32, #tpu.memory_space<vmem>>, %arg5: memref<64x1xf32, #tpu.memory_space<vmem>>, %arg6: memref<1x1xf32, #tpu.memory_space<vmem>>, %arg7: memref<64x1xf32, #tpu.memory_space<vmem>>, %arg8: memref<1x1xf32, #tpu.memory_space<vmem>>, %arg9: memref<8x1xf32, #tpu.memory_space<vmem>>, %arg10: memref<8x1xf32, #tpu.memory_space<vmem>>) attributes {dimension_semantics = [], scalar_prefetch = 0 : i64, scratch_operands = 0 : i64, tpu.core_type = #tpu.core_type<tc>} {
    %c0 = arith.constant 0 : index
    %c0_0 = arith.constant 0 : index
    %0 = vector.load %arg0[%c0, %c0_0] : memref<8x3xf32, #tpu.memory_space<vmem>>, vector<8x3xf32>
    %c0_1 = arith.constant 0 : index
    %c0_2 = arith.constant 0 : index
    %1 = vector.load %arg2[%c0_1, %c0_2] : memref<1x128xf32, #tpu.memory_space<vmem>>, vector<1x128xf32>
    %2 = vector.shape_cast %1 : vector<1x128xf32> to vector<1x128xf32>
    %3 = vector.broadcast %2 : vector<1x128xf32> to vector<8x128xf32>
    %4 = vector.extract_strided_slice %0 {offsets = [0, 0], sizes = [8, 1], strides = [1, 1]} : vector<8x3xf32> to vector<8x1xf32>
    %c0_3 = arith.constant 0 : index
    %c0_4 = arith.constant 0 : index
    %5 = vector.load %arg1[%c0_3, %c0_4] : memref<3x128xf32, #tpu.memory_space<vmem>>, vector<1x128xf32>
    %6 = vector.broadcast %4 : vector<8x1xf32> to vector<8x128xf32>
    %7 = vector.broadcast %5 : vector<1x128xf32> to vector<8x128xf32>
    %8 = arith.mulf %6, %7 : vector<8x128xf32>
    %9 = arith.addf %3, %8 : vector<8x128xf32>
    %10 = vector.extract_strided_slice %0 {offsets = [0, 1], sizes = [8, 1], strides = [1, 1]} : vector<8x3xf32> to vector<8x1xf32>
    %c1 = arith.constant 1 : index
    %c0_5 = arith.constant 0 : index
    %11 = vector.load %arg1[%c1, %c0_5] : memref<3x128xf32, #tpu.memory_space<vmem>>, vector<1x128xf32>
    %12 = vector.broadcast %10 : vector<8x1xf32> to vector<8x128xf32>
    %13 = vector.broadcast %11 : vector<1x128xf32> to vector<8x128xf32>
    %14 = arith.mulf %12, %13 : vector<8x128xf32>
    %15 = arith.addf %9, %14 : vector<8x128xf32>
    %16 = vector.extract_strided_slice %0 {offsets = [0, 2], sizes = [8, 1], strides = [1, 1]} : vector<8x3xf32> to vector<8x1xf32>
    %c2 = arith.constant 2 : index
    %c0_6 = arith.constant 0 : index
    %17 = vector.load %arg1[%c2, %c0_6] : memref<3x128xf32, #tpu.memory_space<vmem>>, vector<1x128xf32>
    %18 = vector.broadcast %16 : vector<8x1xf32> to vector<8x128xf32>
    %19 = vector.broadcast %17 : vector<1x128xf32> to vector<8x128xf32>
    %20 = arith.mulf %18, %19 : vector<8x128xf32>
    %21 = arith.addf %15, %20 : vector<8x128xf32>
    %cst = arith.constant 0.000000e+00 : f32
    %22 = vector.broadcast %cst : f32 to vector<8x128xf32>
    %23 = arith.maximumf %21, %22 : vector<8x128xf32>
    %c0_7 = arith.constant 0 : index
    %c0_8 = arith.constant 0 : index
    %24 = vector.load %arg3[%c0_7, %c0_8] : memref<128x64xf32, #tpu.memory_space<vmem>>, vector<128x64xf32>
    %cst_9 = arith.constant dense<0.000000e+00> : vector<8x64xf32>
    %25 = tpu.matmul %23, %24, %cst_9 {dimension_numbers = #tpu.dot_dimension_numbers<[1], [0], [0], [1], [0, 0, 1, 1], [], []>} : vector<8x128xf32>, vector<128x64xf32>, vector<8x64xf32> -> vector<8x64xf32>
    %c0_10 = arith.constant 0 : index
    %c0_11 = arith.constant 0 : index
    %26 = vector.load %arg4[%c0_10, %c0_11] : memref<1x64xf32, #tpu.memory_space<vmem>>, vector<1x64xf32>
    %27 = vector.broadcast %26 : vector<1x64xf32> to vector<8x64xf32>
    %28 = arith.addf %25, %27 : vector<8x64xf32>
    %cst_12 = arith.constant 0.000000e+00 : f32
    %29 = vector.broadcast %cst_12 : f32 to vector<8x64xf32>
    %30 = arith.maximumf %28, %29 : vector<8x64xf32>
    %c0_13 = arith.constant 0 : index
    %c0_14 = arith.constant 0 : index
    %31 = vector.load %arg5[%c0_13, %c0_14] : memref<64x1xf32, #tpu.memory_space<vmem>>, vector<64x1xf32>
    %cst_15 = arith.constant dense<0.000000e+00> : vector<8x1xf32>
    %32 = tpu.matmul %30, %31, %cst_15 {dimension_numbers = #tpu.dot_dimension_numbers<[1], [0], [0], [1], [0, 0, 1, 1], [], []>} : vector<8x64xf32>, vector<64x1xf32>, vector<8x1xf32> -> vector<8x1xf32>
    %c0_16 = arith.constant 0 : index
    %c0_17 = arith.constant 0 : index
    %33 = vector.load %arg6[%c0_16, %c0_17] : memref<1x1xf32, #tpu.memory_space<vmem>>, vector<1x1xf32>
    %34 = vector.broadcast %33 : vector<1x1xf32> to vector<8x1xf32>
    %35 = arith.addf %32, %34 : vector<8x1xf32>
    %c0_18 = arith.constant 0 : index
    %c0_19 = arith.constant 0 : index
    %36 = vector.load %arg9[%c0_18, %c0_19] : memref<8x1xf32, #tpu.memory_space<vmem>>, vector<8x1xf32>
    tpu.vector_store %arg9[%c0_18, %c0_19], %35 {strides = array<i32>} : memref<8x1xf32, #tpu.memory_space<vmem>>, vector<8x1xf32>,
    %c0_20 = arith.constant 0 : index
    %c0_21 = arith.constant 0 : index
    %37 = vector.load %arg7[%c0_20, %c0_21] : memref<64x1xf32, #tpu.memory_space<vmem>>, vector<64x1xf32>
    %cst_22 = arith.constant dense<0.000000e+00> : vector<8x1xf32>
    %38 = tpu.matmul %30, %37, %cst_22 {dimension_numbers = #tpu.dot_dimension_numbers<[1], [0], [0], [1], [0, 0, 1, 1], [], []>} : vector<8x64xf32>, vector<64x1xf32>, vector<8x1xf32> -> vector<8x1xf32>
    %c0_23 = arith.constant 0 : index
    %c0_24 = arith.constant 0 : index
    %39 = vector.load %arg8[%c0_23, %c0_24] : memref<1x1xf32, #tpu.memory_space<vmem>>, vector<1x1xf32>
    %40 = vector.broadcast %39 : vector<1x1xf32> to vector<8x1xf32>
    %41 = arith.addf %38, %40 : vector<8x1xf32>
    %42 = math.exp %41 : vector<8x1xf32>
    %c0_25 = arith.constant 0 : index
    %c0_26 = arith.constant 0 : index
    %43 = vector.load %arg10[%c0_25, %c0_26] : memref<8x1xf32, #tpu.memory_space<vmem>>, vector<8x1xf32>
    tpu.vector_store %arg10[%c0_25, %c0_26], %42 {strides = array<i32>} : memref<8x1xf32, #tpu.memory_space<vmem>>, vector<8x1xf32>,
    return
  }
}

</mosaic_0001>

<bundles_post_ra>
// kernel: policy_network_forward.1
= control target key start
LH: loop header
LB: loop body
LE: loop exit
PB: predicated region body
PF: predicated region fallthrough
CT: control target
= control target key end

     0   :  { %v539_v0 = vmov 0   ;;  %v540_v2 = vmov 2   ;;  %v541_v8 = vmov 0.0|0.0   ;;  %v542_v12 = vmov 1   ;;  %s750_s0 = inlined_call_operand.vmem [shape: f32[8,3], index: 0, kind: input, shape index: {}]   ;;  %s751_s3 = inlined_call_operand.vmem [shape: f32[128,64], index: 3, kind: input, shape index: {}]   ;;  %s752_s5 = inlined_call_operand.vmem [shape: f32[64,1], index: 5, kind: input, shape index: {}]   ;;  %s753_s1 = inlined_call_operand.vmem [shape: f32[3,128], index: 1, kind: input, shape index: {}]   ;;  %s754_s2 = inlined_call_operand.vmem [shape: f32[1,128], index: 2, kind: input, shape index: {}]   ;;  %s755_s6 = inlined_call_operand.<no memory space> [shape: f32[1,1], index: 6, kind: input, shape index: {}]   ;;  %s756_s4 = inlined_call_operand.vmem [shape: f32[1,64], index: 4, kind: input, shape index: {}]   ;;  %s757_s7 = inlined_call_operand.vmem [shape: f32[64,1], index: 7, kind: input, shape index: {}]   ;;  %s758_s8 = inlined_call_operand.<no memory space> [shape: f32[1,1], index: 8, kind: input, shape index: {}]   ;;  %s759_s9 = inlined_call_operand.vmem [shape: f32[8,1], index: 9, kind: output, shape index: {0}]   ;;  %s760_s10 = inlined_call_operand.vmem [shape: f32[8,1], index: 10, kind: output, shape index: {1}]  }
   0x1   :  { %533 = vset.pattern.permute.xlu0 %v539_v0  ;;  %v38_v1 = vld [vmem:[%s750_s0] sm:$0xff]  ;;  %535 = vset.pattern.permute.xlu1 %v540_v2  ;;  %v82_v4 = vld [vmem:[%s751_s3 + $0x8] sm:$0xff]  ;;  %v83_v6 = vld [vmem:[%s751_s3 + $0x10] sm:$0xff]  ;;  %vm543_vm0 = vmmov 0   ;;  %v544_v19 = vmov 0.0   ;;  %v16_v56 = vstv %s755_s6  ;;  %vm190_vm1 = vcmask 523264  }
   0x2   :  { %v81_v3 = vld [vmem:[%s751_s3] sm:$0xff]  ;;  %49 = vperm.xlu0 %533, %v38_v1   ;;  %71 = vperm.xlu1 %535, %v38_v1   ;;  %v84_v7 = vld [vmem:[%s751_s3 + $0x18] sm:$0xff]  ;;  %v86_v11 = vld [vmem:[%s751_s3 + $0x28] sm:$0xff]  ;;  %17 = vst [vmem:[#allocation2] sm:$0x1] %v16_v56  ;;  %vm264_vm2 = vcmask 7168  }
   0x3   :  { %v480_v5 = vpack.c.bf16 %v82_v4, %v81_v3  ;;  %479 = vmatprep.subr.bf16.mxu0 %v541_v8  ;;  %503 = vmatprep.subr.bf16.mxu1 %v541_v8  ;;  %v483_v9 = vpack.c.bf16 %v84_v7, %v83_v6  ;;  %v85_v10 = vld [vmem:[%s751_s3 + $0x20] sm:$0xff]  ;;  %v87_v14 = vld [vmem:[%s751_s3 + $0x30] sm:$0xff]  ;;  %v88_v15 = vld [vmem:[%s751_s3 + $0x38] sm:$0xff] }
   0x4   :  { %v486_v13 = vpack.c.bf16 %v86_v11, %v85_v10  ;;  %v489_v16 = vpack.c.bf16 %v88_v15, %v87_v14  ;;  %v89_v17 = vld [vmem:[%s751_s3 + $0x40] sm:$0xff]  ;;  %v90_v18 = vld [vmem:[%s751_s3 + $0x48] sm:$0xff]  ;;  %438 = vmatprep.mubr.msk.f32.mxu0 %vm543_vm0, %v544_v19  ;;  %457 = vmatprep.mubr.msk.f32.mxu1 %vm543_vm0, %v544_v19  ;;  %v177_v23 = vld [vmem:[%s752_s5 + $0x10] sm:$0xff]  ;;  %v18_v11 = vstv %s758_s8 }
   0x5   :  { %481 = vmatpush3.bf16.msra.mxu0 %v480_v5  ;;  %v492_v20 = vpack.c.bf16 %v90_v18, %v89_v17  ;;  %v175_v21 = vld [vmem:[%s752_s5] sm:$0xff]  ;;  %v176_v22 = vld [vmem:[%s752_s5 + $0x8] sm:$0xff]  ;;  %v91_v24 = vld [vmem:[%s751_s3 + $0x50] sm:$0xff]  ;;  %19 = vst [vmem:[#allocation3] sm:$0x1] %v18_v11 }
   0x6   :  { %482 = vmatprep.subr.bf16.mxu0 %v541_v8  ;;  %534 = vset.pattern.permute.xlu0 %v542_v12  ;;  %v92_v25 = vld [vmem:[%s751_s3 + $0x58] sm:$0xff]  ;;  %v504_v26 = vpack.c.bf16 %v176_v22, %v175_v21  ;;  %v179_v30 = vld [vmem:[%s752_s5 + $0x20] sm:$0xff]  ;;  %v180_v31 = vld [vmem:[%s752_s5 + $0x28] sm:$0xff] }
   0x7   :  { %60 = vperm.xlu0 %534, %v38_v1   ;;  %v178_v27 = vld [vmem:[%s752_s5 + $0x18] sm:$0xff]  ;;  %v495_v29 = vpack.c.bf16 %v92_v25, %v91_v24  ;;  %v93_v32 = vld [vmem:[%s751_s3 + $0x60] sm:$0xff]  ;;  %v94_v33 = vld [vmem:[%s751_s3 + $0x68] sm:$0xff]  ;;  %v510_v34 = vpack.c.bf16 %v180_v31, %v179_v30 }
   0x8   :  { %505 = vmatpush3.bf16.msra.mxu1 %v504_v26  ;;  %v507_v28 = vpack.c.bf16 %v178_v27, %v177_v23  ;;  %v498_v35 = vpack.c.bf16 %v94_v33, %v93_v32  ;;  %v95_v36 = vld [vmem:[%s751_s3 + $0x70] sm:$0xff]  ;;  %v96_v37 = vld [vmem:[%s751_s3 + $0x78] sm:$0xff]  ;;  %v363_v39 = vld [vmem:[%s753_s1] ss:$0 sm:$0xff] }
   0x9   :  { %484 = vmatpush3.bf16.msra.mxu0 %v483_v9  ;;  %506 = vmatprep.subr.bf16.mxu1 %v541_v8  ;;  %v501_v38 = vpack.c.bf16 %v96_v37, %v95_v36  ;;  %v362_v42 = vld [vmem:[%s754_s2] ss:$0 sm:$0xff]  ;;  %v364_v43 = vld [vmem:[%s753_s1 + $0x1] ss:$0 sm:$0xff]  ;;  %v365_v44 = vld [vmem:[%s753_s1 + $0x2] ss:$0 sm:$0xff] }
   0xa   :  { %485 = vmatprep.subr.bf16.mxu0 %v541_v8  ;;  %v181_v53 = vld [vmem:[%s752_s5 + $0x30] sm:$0xff]  ;;  %v182_v54 = vld [vmem:[%s752_s5 + $0x38] sm:$0xff]  ;;  %v366_v57 = vld [vmem:[%s756_s4] ss:$0 sm:$0xff] }
   0xb   :  { %536 = vset.pattern.permute.xlu0 %v540_v2  ;;  %v513_v55 = vpack.c.bf16 %v182_v54, %v181_v53  ;;  %v266_v58 = vld [vmem:[%s757_s7] sm:$0xff]  ;;  %v267_v59 = vld [vmem:[%s757_s7 + $0x8] sm:$0xff]  ;;  %v268_v1 = vld [vmem:[%s757_s7 + $0x10] sm:$0xff] }
   0xc   :  { %508 = vmatpush3.bf16.msra.mxu1 %v507_v28  ;;  %v516_v63 = vpack.c.bf16 %v267_v59, %v266_v58  ;;  %v269_v2 = vld [vmem:[%s757_s7 + $0x18] sm:$0xff]  ;;  %v270_v4 = vld [vmem:[%s757_s7 + $0x20] sm:$0xff]  ;;  %v271_v5 = vld [vmem:[%s757_s7 + $0x28] sm:$0xff] }
   0xd   :  { %487 = vmatpush3.bf16.msra.mxu0 %v486_v13  ;;  %509 = vmatprep.subr.bf16.mxu1 %v541_v8  ;;  %v519_v3 = vpack.c.bf16 %v269_v2, %v268_v1  ;;  %v522_v6 = vpack.c.bf16 %v271_v5, %v270_v4  ;;  %v272_v7 = vld [vmem:[%s757_s7 + $0x30] sm:$0xff]  ;;  %v273_v9 = vld [vmem:[%s757_s7 + $0x38] sm:$0xff]  ;;  %v367_v12 = vld [vmem:[#allocation2] ss:$0 sm:$0xff] }
   0xe   :  { %488 = vmatprep.subr.bf16.mxu0 %v541_v8  ;;  %v525_v10 = vpack.c.bf16 %v273_v9, %v272_v7 }
  0x10   :  { %511 = vmatpush3.bf16.msra.mxu1 %v510_v34 }
  0x11   :  { %490 = vmatpush3.bf16.msra.mxu0 %v489_v16  ;;  %512 = vmatprep.subr.bf16.mxu1 %v541_v8  ;;  %v369_v16 = vld [vmem:[#allocation3] ss:$0 sm:$0xff] }
  0x12   :  { %491 = vmatprep.subr.bf16.mxu0 %v541_v8 }
  0x14   :  { %514 = vmatpush3.bf16.msra.mxu1 %v513_v55 }
  0x15   :  { %493 = vmatpush3.bf16.msra.mxu0 %v492_v20  ;;  %515 = vmatprep.subr.bf16.mxu1 %v541_v8 }
  0x16   :  { %494 = vmatprep.subr.bf16.mxu0 %v541_v8 }
  0x19   :  { %496 = vmatpush3.bf16.msra.mxu0 %v495_v29 }
  0x1a   :  { %497 = vmatprep.subr.bf16.mxu0 %v541_v8 }
  0x1d   :  { %499 = vmatpush3.bf16.msra.mxu0 %v498_v35 }
  0x1e   :  { %500 = vmatprep.subr.bf16.mxu0 %v541_v8 }
  0x21   :  { %502 = vmatpush3.bf16.msra.mxu0 %v501_v38 }
  0x81   :  { %v50_v40 = vpop.permute.xlu0 %49  ;;  %v72_v45 = vpop.permute.xlu1 %71 }
  0x82   :  { %v56_v41 = vmul.f32 %v363_v39, %v50_v40  ;;  %v78_v49 = vmul.f32 %v365_v44, %v72_v45 }
  0x84   :  { %v57_v47 = vadd.f32 %v362_v42, %v56_v41 }
  0x86   :  { %v61_v46 = vpop.permute.xlu0 %60 }
  0x87   :  { %v67_v48 = vmul.f32 %v364_v43, %v61_v46 }
  0x89   :  { %v68_v50 = vadd.f32 %v67_v48, %v57_v47 }
  0x8b   :  { %v79_v51 = vadd.f32 %v78_v49, %v68_v50 }
  0x8d   :  { %v80_v52 = vmax.f32 %v79_v51, 0.0 }
  0x8f   :  { %439 = vmatmul.mubr.f32.vlgmr.msra.gmra.mrb[0].mxu0 %v80_v52 }
 0x162   :  { %v170_v60 = vpop.f32.mrb[0].mxu0 }
 0x163   :  { %v171_v61 = vadd.f32 %v366_v57, %v170_v60  ;;  %v440_v62 = vpop.f32.mrb[1].mxu0 }
 0x165   :  { %v174_v0 = vmax.f32 %v171_v61, 0.0 }
 0x167   :  { %458 = vmatmul.mubr.msk.f32.vlgmr.msra.gmra.mrb[0].mxu1 %vm190_vm1, %v174_v0 }
 0x168   :  { %517 = vmatpush3.bf16.msra.mxu1 %v516_v63  ;;  %476 = vmatprep.mubr.msk.f32.mxu1 %vm543_vm0, %v544_v19 }
 0x169   :  { %518 = vmatprep.subr.bf16.mxu1 %v541_v8 }
 0x16c   :  { %520 = vmatpush3.bf16.msra.mxu1 %v519_v3 }
 0x16d   :  { %521 = vmatprep.subr.bf16.mxu1 %v541_v8 }
 0x170   :  { %523 = vmatpush3.bf16.msra.mxu1 %v522_v6 }
 0x171   :  { %524 = vmatprep.subr.bf16.mxu1 %v541_v8 }
 0x174   :  { %526 = vmatpush3.bf16.msra.mxu1 %v525_v10 }
 0x177   :  { %477 = vmatmul.mubr.msk.f32.vlgmr.msra.gmra.mrb[2].mxu1 %vm190_vm1, %v174_v0 }
 0x23a   :  { %v260_v13 = vpop.f32.mrb[0].mxu1 }
 0x23b   :  { %v261_v14 = vadd.f32 %v367_v12, %v260_v13  ;;  %v459_v15 = vpop.f32.mrb[1].mxu1 }
 0x23d   :  { %265 = vst.msk [vmem:[%s759_s9] sm:$0xff] %vm264_vm2, %v261_v14 }
 0x24a   :  { %v347_v17 = vpop.f32.mrb[2].mxu1 }
 0x24b   :  { %v348_v8 = vadd.f32 %v369_v16, %v347_v17  ;;  %v478_v18 = vpop.f32.mrb[3].mxu1 }
 0x24d   :  { %v351_v19 = vmul.f32 1.442695, %v348_v8 }
 0x24f   :  { %537 = vpow2.f32 %v351_v19 }
 0x259   :  { %v538_v20 = vpop.eup %537 }
 0x25a   :  { %353 = vst.msk [vmem:[%s760_s10] sm:$0xff] %vm264_vm2, %v538_v20 }

</bundles_post_ra>
